<compile_context>
chip_gen: v5e
topology: v5e:2x2
jax: 0.10.0
libtpu: 0.0.40
codegen_flags: <defaults>
</compile_context>

<pallas_src>
import jax
import jax.numpy as jnp
from jax.experimental import pallas as pl
from jax.experimental.pallas import tpu as pltpu


def _round_up(n, m):
    return ((n + m - 1) // m) * m


def mlp_kernel(x_ref, w1_ref, b1_ref, w2_ref, b2_ref, o_ref):
    # bf16 MXU matmuls with f32 accumulation; bias add + ReLU in f32.
    h = jnp.dot(x_ref[...], w1_ref[...], preferred_element_type=jnp.float32)
    h = jnp.maximum(h + b1_ref[...], 0.0)
    y = jnp.dot(h.astype(w2_ref.dtype), w2_ref[...],
                preferred_element_type=jnp.float32)
    o_ref[...] = (y + b2_ref[...]).astype(o_ref.dtype)


def prepare_params(w1_t, b1, w2_t, b2):
    """One-time preprocessing (outside the jitted forward): zero-pad the hidden dim
    100 -> 128 so both matmuls are lane-dense, and cast weight matrices to bf16."""
    H = w1_t.shape[1]
    Hp = _round_up(H, 128)
    w1p = jnp.pad(w1_t, ((0, 0), (0, Hp - H))).astype(jnp.bfloat16)
    b1p = jnp.pad(b1, ((0, 0), (0, Hp - H))).astype(jnp.float32)
    w2p = jnp.pad(w2_t, ((0, Hp - H), (0, 0))).astype(jnp.bfloat16)
    b2p = b2.astype(jnp.float32)
    return w1p, b1p, w2p, b2p


def _choose_tb(B):
    # >= 2 grid steps so v7x's 2 TensorCores both get a tile; on v5e/v6e the extra
    # step is nearly free.  Cap at 1024 rows for large batches (amortizes per-step
    # overhead while staying far under the scoped VMEM limit on all generations).
    half = _round_up(max(pl.cdiv(B, 2), 8), 8)
    return min(1024, half)


@jax.jit
def mlp_forward(x, w1p, b1p, w2p, b2p):
    """x: [B, 2*C] f32/bf16; w1p: [2*C, Hp] bf16; b1p: [1, Hp] f32;
       w2p: [Hp, C] bf16; b2p: [1, C] f32.  Returns [B, C] f32."""
    B, in_dim = x.shape
    Hp = w1p.shape[1]
    C = w2p.shape[1]

    tb = _choose_tb(B)
    Bp = _round_up(B, tb)

    xb = x.astype(jnp.bfloat16)
    if Bp != B:
        xb = jnp.pad(xb, ((0, Bp - B), (0, 0)))

    grid = (Bp // tb,)
    flops = 2 * Bp * (in_dim * Hp + Hp * C)
    bytes_accessed = (2 * (Bp * in_dim + in_dim * Hp + Hp * C)   # bf16 streams
                      + 4 * (Hp + C + Bp * C))                   # f32 biases + output

    out = pl.pallas_call(
        mlp_kernel,
        out_shape=jax.ShapeDtypeStruct((Bp, C), jnp.float32),
        grid=grid,
        in_specs=[
            # batch-tiled activations (pipelined against the matmuls)
            pl.BlockSpec((tb, in_dim), lambda i: (i, 0)),
            # weights / biases: constant index_map -> VMEM-resident, single-buffered
            pl.BlockSpec((in_dim, Hp), lambda i: (0, 0), pipeline_mode=pl.Buffered(1)),
            pl.BlockSpec((1, Hp), lambda i: (0, 0), pipeline_mode=pl.Buffered(1)),
            pl.BlockSpec((Hp, C), lambda i: (0, 0), pipeline_mode=pl.Buffered(1)),
            pl.BlockSpec((1, C), lambda i: (0, 0), pipeline_mode=pl.Buffered(1)),
        ],
        out_specs=pl.BlockSpec((tb, C), lambda i: (i, 0)),
        compiler_params=pltpu.CompilerParams(
            dimension_semantics=("parallel",)),
        cost_estimate=pl.CostEstimate(
            flops=flops, transcendentals=0, bytes_accessed=bytes_accessed),
    )(xb, w1p, b1p, w2p, b2p)

    return out[:B] if Bp != B else out


def init_params(key, num_classes, hidden=100, dtype=jnp.float32):
    """Deterministic PyTorch-style uniform(-1/sqrt(fan_in), 1/sqrt(fan_in)) init."""
    in_dim = 2 * num_classes
    k1, k2, k3, k4 = jax.random.split(key, 4)
    bound1 = 1.0 / jnp.sqrt(in_dim)
    bound2 = 1.0 / jnp.sqrt(hidden)
    # stored already transposed: (in_features, out_features)
    w1_t = jax.random.uniform(k1, (in_dim, hidden), dtype, -bound1, bound1)
    b1 = jax.random.uniform(k2, (1, hidden), dtype, -bound1, bound1)
    w2_t = jax.random.uniform(k3, (hidden, num_classes), dtype, -bound2, bound2)
    b2 = jax.random.uniform(k4, (1, num_classes), dtype, -bound2, bound2)
    return w1_t, b1, w2_t, b2


def mlp_reference(x, w1_t, b1, w2_t, b2):
    h = jnp.maximum(x @ w1_t + b1, 0.0)
    return h @ w2_t + b2


if __name__ == "__main__":
    num_classes = 16   # module's num_classes  (input dim = 2*C = 32)
    num_layers = 2     # > 0 -> [Linear(2C,100), ReLU, Linear(100,C)]
    batch = 256        # -> tb=128, 2 batch tiles (both v7x TCs busy)

    key = jax.random.PRNGKey(0)
    kx, kp = jax.random.split(key)
    x = jax.random.normal(kx, (batch, 2 * num_classes), jnp.float32)
    w1_t, b1, w2_t, b2 = init_params(kp, num_classes)

    # one-time preprocessing (pad hidden 100->128, cast weights to bf16)
    params = prepare_params(w1_t, b1, w2_t, b2)

    out = mlp_forward(x, *params)
    out = jax.block_until_ready(out)

    ref = mlp_reference(x, w1_t, b1, w2_t, b2)
    assert out.shape == (batch, num_classes)
    # bf16 matmul inputs -> loosened tolerance vs the f32 reference
    assert jnp.allclose(out, ref, atol=5e-2, rtol=5e-2)

    print("KERNEL_OK")
</pallas_src>

<mosaic_0001>
module attributes {stable_mosaic.version = 11 : i64} {
  func.func @mlp_kernel(%arg0: i32, %arg1: memref<128x32xbf16, #tpu.memory_space<vmem>>, %arg2: memref<32x128xbf16, #tpu.memory_space<vmem>>, %arg3: memref<1x128xf32, #tpu.memory_space<vmem>>, %arg4: memref<128x16xbf16, #tpu.memory_space<vmem>>, %arg5: memref<1x16xf32, #tpu.memory_space<vmem>>, %arg6: memref<128x16xf32, #tpu.memory_space<vmem>>) attributes {dimension_semantics = [#tpu.dimension_semantics<parallel>], iteration_bounds = array<i64: 2>, scalar_prefetch = 0 : i64, scratch_operands = 0 : i64, tpu.core_type = #tpu.core_type<tc>, window_params = [{transform_indices = @transform_0, window_bounds = array<i64: 128, 32>}, {pipeline_mode = #tpu.pipeline_mode<synchronous>, transform_indices = @transform_1, window_bounds = array<i64: 32, 128>}, {pipeline_mode = #tpu.pipeline_mode<synchronous>, transform_indices = @transform_2, window_bounds = array<i64: 1, 128>}, {pipeline_mode = #tpu.pipeline_mode<synchronous>, transform_indices = @transform_3, window_bounds = array<i64: 128, 16>}, {pipeline_mode = #tpu.pipeline_mode<synchronous>, transform_indices = @transform_4, window_bounds = array<i64: 1, 16>}, {transform_indices = @transform_5, window_bounds = array<i64: 128, 16>}]} {
    %c0 = arith.constant 0 : index
    %c0_0 = arith.constant 0 : index
    %0 = vector.load %arg1[%c0, %c0_0] : memref<128x32xbf16, #tpu.memory_space<vmem>>, vector<128x32xbf16>
    %c0_1 = arith.constant 0 : index
    %c0_2 = arith.constant 0 : index
    %1 = vector.load %arg2[%c0_1, %c0_2] : memref<32x128xbf16, #tpu.memory_space<vmem>>, vector<32x128xbf16>
    %cst = arith.constant dense<0.000000e+00> : vector<128x128xf32>
    %2 = tpu.matmul %0, %1, %cst {dimension_numbers = #tpu.dot_dimension_numbers<[1], [0], [0], [1], [0, 0, 1, 1], [], []>} : vector<128x32xbf16>, vector<32x128xbf16>, vector<128x128xf32> -> vector<128x128xf32>
    %c0_3 = arith.constant 0 : index
    %c0_4 = arith.constant 0 : index
    %3 = vector.load %arg3[%c0_3, %c0_4] : memref<1x128xf32, #tpu.memory_space<vmem>>, vector<1x128xf32>
    %4 = vector.broadcast %3 : vector<1x128xf32> to vector<128x128xf32>
    %5 = arith.addf %2, %4 : vector<128x128xf32>
    %cst_5 = arith.constant 0.000000e+00 : f32
    %6 = vector.broadcast %cst_5 : f32 to vector<128x128xf32>
    %7 = arith.maximumf %5, %6 : vector<128x128xf32>
    %8 = arith.truncf %7 : vector<128x128xf32> to vector<128x128xbf16>
    %c0_6 = arith.constant 0 : index
    %c0_7 = arith.constant 0 : index
    %9 = vector.load %arg4[%c0_6, %c0_7] : memref<128x16xbf16, #tpu.memory_space<vmem>>, vector<128x16xbf16>
    %cst_8 = arith.constant dense<0.000000e+00> : vector<128x16xf32>
    %10 = tpu.matmul %8, %9, %cst_8 {dimension_numbers = #tpu.dot_dimension_numbers<[1], [0], [0], [1], [0, 0, 1, 1], [], []>} : vector<128x128xbf16>, vector<128x16xbf16>, vector<128x16xf32> -> vector<128x16xf32>
    %c0_9 = arith.constant 0 : index
    %c0_10 = arith.constant 0 : index
    %11 = vector.load %arg5[%c0_9, %c0_10] : memref<1x16xf32, #tpu.memory_space<vmem>>, vector<1x16xf32>
    %12 = vector.broadcast %11 : vector<1x16xf32> to vector<128x16xf32>
    %13 = arith.addf %10, %12 : vector<128x16xf32>
    %c0_11 = arith.constant 0 : index
    %c0_12 = arith.constant 0 : index
    %14 = vector.load %arg6[%c0_11, %c0_12] : memref<128x16xf32, #tpu.memory_space<vmem>>, vector<128x16xf32>
    tpu.vector_store %arg6[%c0_11, %c0_12], %13 {strides = array<i32>} : memref<128x16xf32, #tpu.memory_space<vmem>>, vector<128x16xf32>,
    return
  }
  func.func @transform_0(%arg0: i32) -> (i32, i32) {
    %c0_i32 = arith.constant 0 : i32
    %c0_i32_0 = arith.constant 0 : i32
    return %arg0, %c0_i32 : i32, i32
  }
  func.func @transform_1(%arg0: i32) -> (i32, i32) {
    %c0_i32 = arith.constant 0 : i32
    %c0_i32_0 = arith.constant 0 : i32
    %c0_i32_1 = arith.constant 0 : i32
    return %c0_i32, %c0_i32_0 : i32, i32
  }
  func.func @transform_2(%arg0: i32) -> (i32, i32) {
    %c0_i32 = arith.constant 0 : i32
    %c0_i32_0 = arith.constant 0 : i32
    %c0_i32_1 = arith.constant 0 : i32
    return %c0_i32, %c0_i32_0 : i32, i32
  }
  func.func @transform_3(%arg0: i32) -> (i32, i32) {
    %c0_i32 = arith.constant 0 : i32
    %c0_i32_0 = arith.constant 0 : i32
    %c0_i32_1 = arith.constant 0 : i32
    return %c0_i32, %c0_i32_0 : i32, i32
  }
  func.func @transform_4(%arg0: i32) -> (i32, i32) {
    %c0_i32 = arith.constant 0 : i32
    %c0_i32_0 = arith.constant 0 : i32
    %c0_i32_1 = arith.constant 0 : i32
    return %c0_i32, %c0_i32_0 : i32, i32
  }
  func.func @transform_5(%arg0: i32) -> (i32, i32) {
    %c0_i32 = arith.constant 0 : i32
    %c0_i32_0 = arith.constant 0 : i32
    return %arg0, %c0_i32 : i32, i32
  }
}

</mosaic_0001>

<bundles_post_ra>
// kernel: mlp_forward.1
= control target key start
LH: loop header
LB: loop body
LE: loop exit
PB: predicated region body
PF: predicated region fallthrough
CT: control target
= control target key end

     0   :  { %s760_s18 = smov 0   ;;  %s859_s0 = inlined_call_operand.vmem [shape: bf16[256,32], index: 0, kind: input, shape index: {}]   ;;  %s860_s1 = inlined_call_operand.vmem [shape: bf16[32,128], index: 1, kind: input, shape index: {}]   ;;  %s861_s2 = inlined_call_operand.vmem [shape: f32[1,128], index: 2, kind: input, shape index: {}]   ;;  %s862_s3 = inlined_call_operand.vmem [shape: bf16[128,16], index: 3, kind: input, shape index: {}]   ;;  %s863_s4 = inlined_call_operand.vmem [shape: f32[1,16], index: 4, kind: input, shape index: {}]   ;;  %s864_s5 = inlined_call_operand.vmem [shape: f32[256,16], index: 5, kind: output, shape index: {}]  }
   0x1 LB: > { %s593_s19 = sadd.s32 4294967295, %s728_s18   ;;  %p597_p0 = scmp.ge.s32.totalorder %s728_s18, 1  ;;  %s728_s18 = sphi %s760_s18, %s15_s18  }
   0x2   : > { %p188_p1 = scmp.lt.s32.totalorder %s728_s18, 3 }
   0x4   : > { %p189_p2 = pnand %p597_p0, %p188_p1 }
   0x5   : > { %s598_s22 = sshll.u32 (!%p189_p2), %s593_s19, 4 }
   0x6   : > { %192 = sbr.rel (%p189_p2) target bundleno = 414 (0x19e), region = 40  ;;  %p217_p3 = scmp.lt.s32.totalorder (!%p189_p2), %s598_s22, 31 }
   0xb   : > { %v693_v0 = vld [vmem:[%s860_s1 + $0x8] sm:$0xff]  ;;  %v692_v1 = vld [vmem:[%s860_s1] sm:$0xff]  ;;  %s866_s22 = smov (!%p217_p3, %s598_s22), 31  ;;  %vm305_vm0 = vcmask 261120   ;;  %v701_v6 = vld [vmem:[%s862_s3 + $0x38] sm:$0xff]  ;;  %vm520_vm1 = vcmask 130048  }
   0xc   : > { %336 = vmatpush.bf16.msra.mxu0 %v693_v0  ;;  %702 = vmatpush.bf16.msra.mxu3 %v693_v0  ;;  %s599_s25 = sshll.u32 %s866_s22, 2  ;;  %v700_v7 = vld [vmem:[%s862_s3 + $0x30] sm:$0xff]  ;;  %v699_v8 = vld [vmem:[%s862_s3 + $0x28] sm:$0xff]  ;;  %v698_v10 = vld [vmem:[%s862_s3 + $0x20] sm:$0xff]  ;;  %s601_s24 = sshll.u32 %s866_s22, 3 }
   0xd   : > { %s220_s28 = scalar_lea.vmem %s859_s0, %s599_s25  ;;  %471 = vmatpush.bf16.msra.mxu1 %v701_v6  ;;  %704 = vmatpush.bf16.msra.mxu2 %v701_v6  ;;  %v697_v14 = vld [vmem:[%s862_s3 + $0x18] sm:$0xff]  ;;  %v696_v15 = vld [vmem:[%s862_s3 + $0x10] sm:$0xff]  ;;  %v695_v16 = vld [vmem:[%s862_s3 + $0x8] sm:$0xff]  ;;  %s822_s29 = scalar_lea.vmem %s864_s5, %s601_s24 }
   0xe   : > { %v684_v2 = vld [vmem:[%s220_s28] sm:$0xff]  ;;  %v685_v3 = vld [vmem:[%s220_s28 + $0x8] sm:$0xff]  ;;  %v686_v4 = vld [vmem:[%s220_s28 + $0x10] sm:$0xff] }
   0xf   : > { %v689_v5 = vld [vmem:[%s220_s28 + $0x28] sm:$0xff]  ;;  %v687_v9 = vld [vmem:[%s220_s28 + $0x18] sm:$0xff]  ;;  %v690_v11 = vld [vmem:[%s220_s28 + $0x30] sm:$0xff] }
  0x10   : > { %337 = vmatpush.bf16.msra.mxu0 %v692_v1  ;;  %703 = vmatpush.bf16.msra.mxu3 %v692_v1  ;;  %v688_v12 = vld [vmem:[%s220_s28 + $0x20] sm:$0xff]  ;;  %v691_v13 = vld [vmem:[%s220_s28 + $0x38] sm:$0xff] }
  0x11   : > { %472 = vmatpush.bf16.msra.mxu1 %v700_v7  ;;  %705 = vmatpush.bf16.msra.mxu2 %v700_v7  ;;  %v694_v17 = vld [vmem:[%s862_s3] sm:$0xff] }
  0x12   : > { %v720_v19 = vld [vmem:[%s861_s2] ss:$0 sm:$0xff] }
  0x13   : > { %642 = vmatmul.msk.bf16.vlgmr.msra.gmra.mxu0 %vm305_vm0, %v684_v2  ;;  %647 = vmatmul.msk.bf16.vlgmr.msra.gmra.mxu3 %vm305_vm0, %v689_v5 }
  0x15   : > { %473 = vmatpush.bf16.msra.mxu1 %v699_v8  ;;  %706 = vmatpush.bf16.msra.mxu2 %v699_v8 }
  0x19   : > { %474 = vmatpush.bf16.msra.mxu1 %v698_v10  ;;  %707 = vmatpush.bf16.msra.mxu2 %v698_v10 }
  0x1d   : > { %475 = vmatpush.bf16.msra.mxu1 %v697_v14  ;;  %708 = vmatpush.bf16.msra.mxu2 %v697_v14 }
  0x21   : > { %476 = vmatpush.bf16.msra.mxu1 %v696_v15  ;;  %709 = vmatpush.bf16.msra.mxu2 %v696_v15 }
  0x23   : > { %643 = vmatmul.msk.bf16.gmra.mxu0 %vm305_vm0, %v685_v3  ;;  %648 = vmatmul.msk.bf16.gmra.mxu3 %vm305_vm0, %v690_v11  ;;  %v721_v11 = vld [vmem:[%s863_s4] ss:$0 sm:$0xff] }
  0x25   : > { %477 = vmatpush.bf16.msra.mxu1 %v695_v16  ;;  %710 = vmatpush.bf16.msra.mxu2 %v695_v16 }
  0x29   : > { %478 = vmatpush.bf16.msra.mxu1 %v694_v17  ;;  %711 = vmatpush.bf16.msra.mxu2 %v694_v17 }
  0x33   : > { %644 = vmatmul.msk.bf16.gmra.mxu0 %vm305_vm0, %v686_v4  ;;  %649 = vmatmul.msk.bf16.gmra.mxu3 %vm305_vm0, %v691_v13 }
  0x43   : > { %645 = vmatmul.msk.bf16.gmra.mxu0 %vm305_vm0, %v687_v9 }
  0x53   : > { %646 = vmatmul.msk.bf16.gmra.mxu0 %vm305_vm0, %v688_v12 }
  0x90   : > { %v339_v18 = vpop.f32.mrf.mxu0 }
  0x91   : > { %v340_v20 = vadd.f32 %v720_v19, %v339_v18 }
  0x93   : > { %v379_v23 = vmax.f32 %v340_v20, 0.0 }
  0x96   : > { %v364_v48 = vpop.f32.mrf.mxu3 }
  0x97   : > { %v365_v57 = vadd.f32 %v720_v19, %v364_v48 }
  0x98   : > { %v341_v21 = vpop.f32.mrf.mxu0 }
  0x99   : > { %v342_v22 = vadd.f32 %v720_v19, %v341_v21  ;;  %v389_v59 = vmax.f32 %v365_v57, 0.0 }
  0x9b   : > { %v380_v24 = vmax.f32 %v342_v22, 0.0 }
  0x9d   : > { %v395_v25 = vpack.c.bf16 %v380_v24, %v379_v23 }
  0x9e   : > { %v366_v52 = vpop.f32.mrf.mxu3 }
  0x9f   : > { %479 = vmatmul.bf16.vlgmr.msra.gmra.mxu1 %v395_v25  ;;  %v367_v58 = vadd.f32 %v720_v19, %v366_v52 }
  0xa0   : > { %v344_v26 = vpop.f32.mrf.mxu0 }
  0xa1   : > { %v345_v27 = vadd.f32 %v720_v19, %v344_v26  ;;  %v390_v60 = vmax.f32 %v367_v58, 0.0 }
  0xa3   : > { %v381_v30 = vmax.f32 %v345_v27, 0.0  ;;  %v400_v61 = vpack.c.bf16 %v390_v60, %v389_v59 }
  0xa6   : > { %v369_v56 = vpop.f32.mrf.mxu3 }
  0xa7   : > { %v370_v63 = vadd.f32 %v720_v19, %v369_v56 }
  0xa8   : > { %v346_v28 = vpop.f32.mrf.mxu0 }
  0xa9   : > { %v347_v29 = vadd.f32 %v720_v19, %v346_v28  ;;  %v391_v2 = vmax.f32 %v370_v63, 0.0 }
  0xab   : > { %v382_v31 = vmax.f32 %v347_v29, 0.0 }
  0xad   : > { %v396_v32 = vpack.c.bf16 %v382_v31, %v381_v30 }
  0xae   : > { %v371_v62 = vpop.f32.mrf.mxu3 }
  0xaf   : > { %484 = vmatmul.bf16.gmra.mxu1 %v396_v32  ;;  %v372_v0 = vadd.f32 %v720_v19, %v371_v62 }
  0xb0   : > { %v349_v33 = vpop.f32.mrf.mxu0 }
  0xb1   : > { %v350_v34 = vadd.f32 %v720_v19, %v349_v33  ;;  %v392_v3 = vmax.f32 %v372_v0, 0.0 }
  0xb3   : > { %v383_v37 = vmax.f32 %v350_v34, 0.0  ;;  %v401_v4 = vpack.c.bf16 %v392_v3, %v391_v2 }
  0xb6   : > { %v374_v1 = vpop.f32.mrf.mxu3 }
  0xb7   : > { %v375_v6 = vadd.f32 %v720_v19, %v374_v1 }
  0xb8   : > { %v351_v35 = vpop.f32.mrf.mxu0 }
  0xb9   : > { %v352_v36 = vadd.f32 %v720_v19, %v351_v35  ;;  %v393_v8 = vmax.f32 %v375_v6, 0.0 }
  0xbb   : > { %v384_v38 = vmax.f32 %v352_v36, 0.0 }
  0xbd   : > { %v397_v39 = vpack.c.bf16 %v384_v38, %v383_v37 }
  0xbe   : > { %v376_v5 = vpop.f32.mrf.mxu3 }
  0xbf   : > { %489 = vmatmul.bf16.gmra.mxu1 %v397_v39  ;;  %v377_v7 = vadd.f32 %v720_v19, %v376_v5 }
  0xc0   : > { %v354_v40 = vpop.f32.mrf.mxu0 }
  0xc1   : > { %v355_v41 = vadd.f32 %v720_v19, %v354_v40  ;;  %v394_v9 = vmax.f32 %v377_v7, 0.0 }
  0xc3   : > { %v385_v44 = vmax.f32 %v355_v41, 0.0  ;;  %v402_v10 = vpack.c.bf16 %v394_v9, %v393_v8 }
  0xc8   : > { %v356_v42 = vpop.f32.mrf.mxu0 }
  0xc9   : > { %v357_v43 = vadd.f32 %v720_v19, %v356_v42 }
  0xcb   : > { %v386_v45 = vmax.f32 %v357_v43, 0.0 }
  0xcd   : > { %v398_v46 = vpack.c.bf16 %v386_v45, %v385_v44 }
  0xcf   : > { %494 = vmatmul.bf16.gmra.mxu1 %v398_v46 }
  0xd0   : > { %v359_v47 = vpop.f32.mrf.mxu0 }
  0xd1   : > { %v360_v49 = vadd.f32 %v720_v19, %v359_v47 }
  0xd3   : > { %v387_v53 = vmax.f32 %v360_v49, 0.0 }
  0xd8   : > { %v361_v50 = vpop.f32.mrf.mxu0 }
  0xd9   : > { %v362_v51 = vadd.f32 %v720_v19, %v361_v50 }
  0xdb   : > { %v388_v54 = vmax.f32 %v362_v51, 0.0 }
  0xdd   : > { %v399_v55 = vpack.c.bf16 %v388_v54, %v387_v53 }
  0xdf   : > { %499 = vmatmul.bf16.vlgmr.msra.gmra.mxu2 %v399_v55 }
  0xef   : > { %504 = vmatmul.bf16.gmra.mxu2 %v400_v61 }
  0xff   : > { %509 = vmatmul.bf16.gmra.mxu2 %v401_v4 }
 0x10f   : > { %514 = vmatmul.bf16.gmra.mxu2 %v402_v10 }
 0x11c   : > { %v480_v12 = vpop.f32.mrf.mxu1 }
 0x11d   : > { %v481_v13 = vadd.f32 %v721_v11, %v480_v12 }
 0x11f   : > { %521 = vst.msk [vmem:[%s822_s29] sm:$0xff] %vm520_vm1, %v481_v13 }
 0x124   : > { %v482_v14 = vpop.f32.mrf.mxu1 }
 0x125   : > { %v483_v15 = vadd.f32 %v721_v11, %v482_v14 }
 0x127   : > { %522 = vst.msk [vmem:[%s822_s29 + $0x8] sm:$0xff] %vm520_vm1, %v483_v15 }
 0x12c   : > { %v485_v16 = vpop.f32.mrf.mxu1 }
 0x12d   : > { %v486_v17 = vadd.f32 %v721_v11, %v485_v16 }
 0x12f   : > { %523 = vst.msk [vmem:[%s822_s29 + $0x10] sm:$0xff] %vm520_vm1, %v486_v17 }
 0x134   : > { %v487_v18 = vpop.f32.mrf.mxu1 }
 0x135   : > { %v488_v19 = vadd.f32 %v721_v11, %v487_v18 }
 0x137   : > { %524 = vst.msk [vmem:[%s822_s29 + $0x18] sm:$0xff] %vm520_vm1, %v488_v19 }
 0x13c   : > { %v490_v20 = vpop.f32.mrf.mxu1 }
 0x13d   : > { %v491_v21 = vadd.f32 %v721_v11, %v490_v20 }
 0x13f   : > { %525 = vst.msk [vmem:[%s822_s29 + $0x20] sm:$0xff] %vm520_vm1, %v491_v21 }
 0x144   : > { %v492_v22 = vpop.f32.mrf.mxu1 }
 0x145   : > { %v493_v23 = vadd.f32 %v721_v11, %v492_v22 }
 0x147   : > { %526 = vst.msk [vmem:[%s822_s29 + $0x28] sm:$0xff] %vm520_vm1, %v493_v23 }
 0x14c   : > { %v495_v24 = vpop.f32.mrf.mxu1 }
 0x14d   : > { %v496_v25 = vadd.f32 %v721_v11, %v495_v24 }
 0x14f   : > { %527 = vst.msk [vmem:[%s822_s29 + $0x30] sm:$0xff] %vm520_vm1, %v496_v25 }
 0x154   : > { %v497_v26 = vpop.f32.mrf.mxu1 }
 0x155   : > { %v498_v27 = vadd.f32 %v721_v11, %v497_v26 }
 0x157   : > { %528 = vst.msk [vmem:[%s822_s29 + $0x38] sm:$0xff] %vm520_vm1, %v498_v27 }
 0x162   : > { %v500_v28 = vpop.f32.mrf.mxu2 }
 0x163   : > { %v501_v29 = vadd.f32 %v721_v11, %v500_v28 }
 0x165   : > { %529 = vst.msk [vmem:[%s822_s29 + $0x40] sm:$0xff] %vm520_vm1, %v501_v29 }
 0x16a   : > { %v502_v30 = vpop.f32.mrf.mxu2 }
 0x16b   : > { %v503_v31 = vadd.f32 %v721_v11, %v502_v30 }
 0x16d   : > { %530 = vst.msk [vmem:[%s822_s29 + $0x48] sm:$0xff] %vm520_vm1, %v503_v31 }
 0x172   : > { %v505_v32 = vpop.f32.mrf.mxu2 }
 0x173   : > { %v506_v33 = vadd.f32 %v721_v11, %v505_v32 }
 0x175   : > { %531 = vst.msk [vmem:[%s822_s29 + $0x50] sm:$0xff] %vm520_vm1, %v506_v33 }
 0x17a   : > { %v507_v34 = vpop.f32.mrf.mxu2 }
 0x17b   : > { %v508_v35 = vadd.f32 %v721_v11, %v507_v34 }
 0x17d   : > { %532 = vst.msk [vmem:[%s822_s29 + $0x58] sm:$0xff] %vm520_vm1, %v508_v35 }
 0x182   : > { %v510_v36 = vpop.f32.mrf.mxu2 }
 0x183   : > { %v511_v37 = vadd.f32 %v721_v11, %v510_v36 }
 0x185   : > { %533 = vst.msk [vmem:[%s822_s29 + $0x60] sm:$0xff] %vm520_vm1, %v511_v37 }
 0x18a   : > { %v512_v38 = vpop.f32.mrf.mxu2 }
 0x18b   : > { %v513_v39 = vadd.f32 %v721_v11, %v512_v38 }
 0x18d   : > { %534 = vst.msk [vmem:[%s822_s29 + $0x68] sm:$0xff] %vm520_vm1, %v513_v39 }
 0x192   : > { %v515_v40 = vpop.f32.mrf.mxu2 }
 0x193   : > { %v516_v41 = vadd.f32 %v721_v11, %v515_v40 }
 0x195   : > { %535 = vst.msk [vmem:[%s822_s29 + $0x70] sm:$0xff] %vm520_vm1, %v516_v41 }
 0x19a   : > { %v517_v42 = vpop.f32.mrf.mxu2 }
 0x19b   : > { %v518_v43 = vadd.f32 %v721_v11, %v517_v42 }
 0x19d   : > { %536 = vst.msk [vmem:[%s822_s29 + $0x78] sm:$0xff] %vm520_vm1, %v518_v43 }
 0x19e PF: > { %s15_s18 = sadd.s32 1, %s728_s18  }
 0x19f   : > { %p12_p4 = scmp.ge.s32.totalorder %s15_s18, 4  }
 0x1a1   :  { %14 = sbr.rel (!%p12_p4) target bundleno = 1 (0x1), region = 70 }

</bundles_post_ra>
